<compile_context>
chip_gen: v7x
topology: tpu7x:2x2x1
jax: 0.10.0
libtpu: 0.0.40
codegen_flags: <defaults>
</compile_context>

<pallas_src>
import functools

import jax
import jax.numpy as jnp
from jax.experimental import pallas as pl
from jax.experimental.pallas import tpu as pltpu

_LANE = 128
_SUBLANE = 8


def _round_up(n, m):
    return ((n + m - 1) // m) * m


def _vmem_cap_bytes():
    """~75% of physical VMEM (~96 MiB v5e/v6e, ~48 MiB v7x); 64 MiB fallback."""
    try:
        cap = int(pltpu.get_tpu_info().vmem_capacity_bytes)
        if cap > 0:
            return max(int(cap * 0.75), 32 << 20)
    except Exception:
        pass
    return 64 << 20


def _make_fused_kernel(num_layers, compute_dtype):
    """Kernel over one batch tile: chains all Linear+sigmoid layers in VMEM/vregs."""

    def kernel(*refs):
        # refs = (x_ref, wt_0, b_0, wt_1, b_1, ..., o_ref)
        x_ref = refs[0]
        o_ref = refs[-1]
        h = x_ref[...].astype(compute_dtype)          # single input cast per tile
        for l in range(num_layers):
            wt = refs[1 + 2 * l][...]                 # already compute_dtype, VMEM-resident
            b = refs[2 + 2 * l][...]                  # f32 (1, out_pad): exact bias add
            z = jnp.dot(h, wt, preferred_element_type=jnp.float32) + b
            # tanh2(z) = (tanh(z/2) + 1) / 2 == sigmoid(z)
            if l + 1 < num_layers:
                # intermediate layers: bf16 EUP sigmoid, result feeds next matmul directly
                h = jax.nn.sigmoid(z.astype(compute_dtype))
            else:
                # final layer: keep the sigmoid in f32 for output accuracy
                o_ref[...] = jax.nn.sigmoid(z).astype(o_ref.dtype)

    return kernel


def _fused_forward(x, wts, bs, *, out_features, compute_dtype,
                   weight_buffer_count, vmem_cap):
    """Fused forward pass.

    x   : (batch, in_features)              float32
    wts : tuple of (in_dim_l, out_pad_l)    compute_dtype, pre-transposed, zero-padded
    bs  : tuple of (1, out_pad_l)           float32, zero-padded
    """
    batch, in_f = x.shape
    num_layers = len(wts)
    out_pad_last = wts[-1].shape[1]
    max_out_pad = max(w.shape[1] for w in wts)

    w_itemsize = jnp.dtype(compute_dtype).itemsize
    weight_bytes = (sum(w.size for w in wts) * w_itemsize
                    + sum(b.size for b in bs) * 4)
    wbuf = 2 if weight_buffer_count is None else weight_buffer_count

    # --- batch tiling: >=2 grid steps when possible (v7x 2-TC), <=512 rows,
    #     split evenly to avoid dead padded rows in the last tile.
    max_tile = 512
    n_steps = max(2, pl.cdiv(batch, max_tile))
    tm = min(max_tile, max(_SUBLANE, _round_up(pl.cdiv(batch, n_steps), _SUBLANE)))

    def _vmem_needed(tile):
        return (wbuf * weight_bytes
                + 2 * tile * in_f * 4            # double-buffered input tile (f32)
                + 2 * tile * out_pad_last * 4    # double-buffered output tile (f32)
                + 3 * tile * max_out_pad * 4)    # live per-layer intermediates

    # Shrink the batch tile if the resident-weight strategy would overflow VMEM.
    while tm > _SUBLANE and _vmem_needed(tm) > vmem_cap:
        tm = _round_up(tm // 2, _SUBLANE)

    batch_pad = _round_up(batch, tm)
    grid = (batch_pad // tm,)

    # Only pad rows when needed (no lane padding: first-layer weight keeps real in_f).
    if batch_pad != batch:
        x_in = jnp.zeros((batch_pad, in_f), x.dtype).at[:batch].set(x)
    else:
        x_in = x

    def _const_spec(shape):
        idx = lambda i: (0,) * len(shape)
        if weight_buffer_count is None:
            return pl.BlockSpec(shape, idx)
        # constant index_map -> revisited block; single-buffering halves its VMEM
        return pl.BlockSpec(shape, idx, pipeline_mode=pl.Buffered(weight_buffer_count))

    in_specs = [pl.BlockSpec((tm, in_f), lambda i: (i, 0))]
    for wt, b in zip(wts, bs):
        in_specs.append(_const_spec(wt.shape))
        in_specs.append(_const_spec(b.shape))
    out_specs = pl.BlockSpec((tm, out_pad_last), lambda i: (i, 0))

    # Advisory cost estimate for XLA's scheduler.
    flops = 2 * batch_pad * sum(w.shape[0] * w.shape[1] for w in wts)
    transcendentals = batch_pad * sum(w.shape[1] for w in wts)
    bytes_accessed = (x_in.size * 4 + weight_bytes + batch_pad * out_pad_last * 4)

    vmem_needed = _vmem_needed(tm)
    vmem_limit = max(32 << 20, min(int(vmem_needed * 1.25) + (8 << 20), vmem_cap))

    out = pl.pallas_call(
        _make_fused_kernel(num_layers, compute_dtype),
        out_shape=jax.ShapeDtypeStruct((batch_pad, out_pad_last), jnp.float32),
        grid=grid,
        in_specs=in_specs,
        out_specs=out_specs,
        compiler_params=pltpu.CompilerParams(
            dimension_semantics=("parallel",),
            vmem_limit_bytes=vmem_limit,
        ),
        cost_estimate=pl.CostEstimate(
            flops=flops,
            transcendentals=transcendentals,
            bytes_accessed=bytes_accessed,
        ),
    )(x_in, *[a for pair in zip(wts, bs) for a in pair])

    if batch_pad != batch or out_pad_last != out_features:
        out = out[:batch, :out_features]
    return out


class AutoEncoderPallas:
    """JAX/Pallas port of the PyTorch AutoEncoder (forward pass, eval mode)."""

    def __init__(self, layers, p=0.0, key=None, compute_dtype=jnp.bfloat16):
        # p=0.0 dropout is the identity (matches the module's default / eval mode).
        assert p == 0.0, "only p=0.0 (eval-mode identity dropout) is implemented"
        if key is None:
            key = jax.random.PRNGKey(0)

        self.layers = list(layers)
        self.out_features = layers[-1]
        self.compute_dtype = compute_dtype
        self.weights = []   # PyTorch-style (out, in) f32 masters — reference / weight norm
        self.biases = []
        wts = []            # padded, transposed, compute_dtype (in_dim, out_pad) — kernel operands
        bs = []             # padded f32 (1, out_pad)

        # Deterministic init mimicking nn.Linear default: U(-1/sqrt(in), 1/sqrt(in)).
        for l, (i, o) in enumerate(zip(layers[:-1], layers[1:])):
            key, kw, kb = jax.random.split(key, 3)
            bound = 1.0 / (float(i) ** 0.5)
            w = jax.random.uniform(kw, (o, i), jnp.float32, -bound, bound)
            b = jax.random.uniform(kb, (o,), jnp.float32, -bound, bound)
            self.weights.append(w)
            self.biases.append(b)

            # Layer 0 keeps the real input dim (no wrapper-side lane padding of x);
            # deeper layers' input dim matches the previous layer's padded output,
            # with ZERO rows in the padded region (neutralizes sigmoid(0)=0.5 lanes).
            in_rows = i if l == 0 else _round_up(i, _LANE)
            out_cols = _round_up(o, _LANE)
            wt_p = (jnp.zeros((in_rows, out_cols), compute_dtype)
                    .at[:i, :o].set(w.T.astype(compute_dtype)))
            b_p = jnp.zeros((1, out_cols), jnp.float32).at[0, :o].set(b)
            wts.append(wt_p)
            bs.append(b_p)

        self._wts = tuple(wts)
        self._bs = tuple(bs)

        common = dict(out_features=self.out_features, compute_dtype=compute_dtype,
                      vmem_cap=_vmem_cap_bytes())
        self._fwd_buffered = jax.jit(functools.partial(
            _fused_forward, weight_buffer_count=1, **common))
        self._fwd_default = jax.jit(functools.partial(
            _fused_forward, weight_buffer_count=None, **common))
        self._forward = None

    def get_weight_norm(self):
        """Return sum_l ||W^l||_F^2 (matches the PyTorch method)."""
        return sum(jnp.sum(w * w) for w in self.weights)

    def __call__(self, inputs):
        if self._forward is None:
            try:
                out = self._fwd_buffered(inputs, self._wts, self._bs)
                out = jax.block_until_ready(out)
                self._forward = self._fwd_buffered
                return out
            except Exception:
                # pl.Buffered(1) not supported here -> default double-buffered specs.
                self._forward = self._fwd_default
        return self._forward(inputs, self._wts, self._bs)


def _reference_forward(x, weights, biases):
    """Pure-JAX reference matching the PyTorch forward semantics (f32)."""
    out = x
    for w, b in zip(weights, biases):
        z = jnp.dot(out, w.T, precision=jax.lax.Precision.HIGHEST) + b
        out = (jnp.tanh(z / 2.0) + 1.0) / 2.0
    return out


if __name__ == "__main__":
    layers = [32, 16, 32]   # encoder 32->16, decoder 16->32 (autoencoder shape)
    batch = 8

    key = jax.random.PRNGKey(0)
    key, kx = jax.random.split(key)
    x = jax.random.normal(kx, (batch, layers[0]), jnp.float32)

    # f32 kernel path: near-exact vs reference.
    model_f32 = AutoEncoderPallas(layers, p=0.0, key=jax.random.PRNGKey(0),
                                  compute_dtype=jnp.float32)
    y32 = jax.block_until_ready(model_f32(x))
    y_ref = _reference_forward(x, model_f32.weights, model_f32.biases)
    assert y32.shape == (batch, layers[-1])
    assert jnp.allclose(y32, y_ref, atol=1e-3, rtol=1e-3), "f32 mismatch vs reference"

    # Default bf16 path (v6e/v7x MXU / EUP): looser tolerance, bf16 inter-layer activations.
    model = AutoEncoderPallas(layers, p=0.0, key=jax.random.PRNGKey(0))
    y = jax.block_until_ready(model(x))
    assert y.shape == (batch, layers[-1])
    assert jnp.allclose(y, y_ref, atol=5e-2, rtol=5e-2), "bf16 mismatch vs reference"

    # weight-norm helper sanity check
    _ = jax.block_until_ready(model.get_weight_norm())

    print("KERNEL_OK")
</pallas_src>

<mosaic_0001>
module attributes {stable_mosaic.version = 11 : i64} {
  func.func @kernel(%arg0: i32, %arg1: memref<8x32xf32, #tpu.memory_space<vmem>>, %arg2: memref<32x128xf32, #tpu.memory_space<vmem>>, %arg3: memref<1x128xf32, #tpu.memory_space<vmem>>, %arg4: memref<128x128xf32, #tpu.memory_space<vmem>>, %arg5: memref<1x128xf32, #tpu.memory_space<vmem>>, %arg6: memref<8x128xf32, #tpu.memory_space<vmem>>) attributes {dimension_semantics = [#tpu.dimension_semantics<parallel>], iteration_bounds = array<i64: 1>, scalar_prefetch = 0 : i64, scratch_operands = 0 : i64, tpu.core_type = #tpu.core_type<tc>, window_params = [{transform_indices = @transform_0, window_bounds = array<i64: 8, 32>}, {pipeline_mode = #tpu.pipeline_mode<synchronous>, transform_indices = @transform_1, window_bounds = array<i64: 32, 128>}, {pipeline_mode = #tpu.pipeline_mode<synchronous>, transform_indices = @transform_2, window_bounds = array<i64: 1, 128>}, {pipeline_mode = #tpu.pipeline_mode<synchronous>, transform_indices = @transform_3, window_bounds = array<i64: 128, 128>}, {pipeline_mode = #tpu.pipeline_mode<synchronous>, transform_indices = @transform_4, window_bounds = array<i64: 1, 128>}, {transform_indices = @transform_5, window_bounds = array<i64: 8, 128>}]} {
    %c0 = arith.constant 0 : index
    %c0_0 = arith.constant 0 : index
    %0 = vector.load %arg1[%c0, %c0_0] : memref<8x32xf32, #tpu.memory_space<vmem>>, vector<8x32xf32>
    %c0_1 = arith.constant 0 : index
    %c0_2 = arith.constant 0 : index
    %1 = vector.load %arg2[%c0_1, %c0_2] : memref<32x128xf32, #tpu.memory_space<vmem>>, vector<32x128xf32>
    %c0_3 = arith.constant 0 : index
    %c0_4 = arith.constant 0 : index
    %2 = vector.load %arg3[%c0_3, %c0_4] : memref<1x128xf32, #tpu.memory_space<vmem>>, vector<1x128xf32>
    %cst = arith.constant dense<0.000000e+00> : vector<8x128xf32>
    %3 = tpu.matmul %0, %1, %cst {dimension_numbers = #tpu.dot_dimension_numbers<[1], [0], [0], [1], [0, 0, 1, 1], [], []>} : vector<8x32xf32>, vector<32x128xf32>, vector<8x128xf32> -> vector<8x128xf32>
    %4 = vector.broadcast %2 : vector<1x128xf32> to vector<8x128xf32>
    %5 = arith.addf %3, %4 : vector<8x128xf32>
    %6 = arith.negf %5 : vector<8x128xf32>
    %7 = math.exp %6 : vector<8x128xf32>
    %cst_5 = arith.constant 1.000000e+00 : f32
    %8 = vector.broadcast %cst_5 : f32 to vector<8x128xf32>
    %9 = arith.addf %8, %7 : vector<8x128xf32>
    %10 = arith.divf %8, %9 : vector<8x128xf32>
    %c0_6 = arith.constant 0 : index
    %c0_7 = arith.constant 0 : index
    %11 = vector.load %arg4[%c0_6, %c0_7] : memref<128x128xf32, #tpu.memory_space<vmem>>, vector<128x128xf32>
    %c0_8 = arith.constant 0 : index
    %c0_9 = arith.constant 0 : index
    %12 = vector.load %arg5[%c0_8, %c0_9] : memref<1x128xf32, #tpu.memory_space<vmem>>, vector<1x128xf32>
    %cst_10 = arith.constant dense<0.000000e+00> : vector<8x128xf32>
    %13 = tpu.matmul %10, %11, %cst_10 {dimension_numbers = #tpu.dot_dimension_numbers<[1], [0], [0], [1], [0, 0, 1, 1], [], []>} : vector<8x128xf32>, vector<128x128xf32>, vector<8x128xf32> -> vector<8x128xf32>
    %14 = vector.broadcast %12 : vector<1x128xf32> to vector<8x128xf32>
    %15 = arith.addf %13, %14 : vector<8x128xf32>
    %16 = arith.negf %15 : vector<8x128xf32>
    %17 = math.exp %16 : vector<8x128xf32>
    %cst_11 = arith.constant 1.000000e+00 : f32
    %18 = vector.broadcast %cst_11 : f32 to vector<8x128xf32>
    %19 = arith.addf %18, %17 : vector<8x128xf32>
    %20 = arith.divf %18, %19 : vector<8x128xf32>
    %c0_12 = arith.constant 0 : index
    %c0_13 = arith.constant 0 : index
    %21 = vector.load %arg6[%c0_12, %c0_13] : memref<8x128xf32, #tpu.memory_space<vmem>>, vector<8x128xf32>
    tpu.vector_store %arg6[%c0_12, %c0_13], %20 {strides = array<i32>} : memref<8x128xf32, #tpu.memory_space<vmem>>, vector<8x128xf32>,
    return
  }
  func.func @transform_0(%arg0: i32) -> (i32, i32) {
    %c0_i32 = arith.constant 0 : i32
    %c0_i32_0 = arith.constant 0 : i32
    return %arg0, %c0_i32 : i32, i32
  }
  func.func @transform_1(%arg0: i32) -> (i32, i32) {
    %c0_i32 = arith.constant 0 : i32
    %c0_i32_0 = arith.constant 0 : i32
    %c0_i32_1 = arith.constant 0 : i32
    return %c0_i32, %c0_i32_0 : i32, i32
  }
  func.func @transform_2(%arg0: i32) -> (i32, i32) {
    %c0_i32 = arith.constant 0 : i32
    %c0_i32_0 = arith.constant 0 : i32
    %c0_i32_1 = arith.constant 0 : i32
    return %c0_i32, %c0_i32_0 : i32, i32
  }
  func.func @transform_3(%arg0: i32) -> (i32, i32) {
    %c0_i32 = arith.constant 0 : i32
    %c0_i32_0 = arith.constant 0 : i32
    %c0_i32_1 = arith.constant 0 : i32
    return %c0_i32, %c0_i32_0 : i32, i32
  }
  func.func @transform_4(%arg0: i32) -> (i32, i32) {
    %c0_i32 = arith.constant 0 : i32
    %c0_i32_0 = arith.constant 0 : i32
    %c0_i32_1 = arith.constant 0 : i32
    return %c0_i32, %c0_i32_0 : i32, i32
  }
  func.func @transform_5(%arg0: i32) -> (i32, i32) {
    %c0_i32 = arith.constant 0 : i32
    %c0_i32_0 = arith.constant 0 : i32
    return %arg0, %c0_i32 : i32, i32
  }
}

module attributes {stable_mosaic.version = 11 : i64} {
  func.func @kernel(%arg0: i32, %arg1: memref<8x32xf32, #tpu.memory_space<vmem>>, %arg2: memref<32x128xf32, #tpu.memory_space<vmem>>, %arg3: memref<1x128xf32, #tpu.memory_space<vmem>>, %arg4: memref<128x128xf32, #tpu.memory_space<vmem>>, %arg5: memref<1x128xf32, #tpu.memory_space<vmem>>, %arg6: memref<8x128xf32, #tpu.memory_space<vmem>>) attributes {dimension_semantics = [#tpu.dimension_semantics<parallel>], iteration_bounds = array<i64: 1>, scalar_prefetch = 0 : i64, scratch_operands = 0 : i64, tpu.core_type = #tpu.core_type<tc>, window_params = [{transform_indices = @transform_0, window_bounds = array<i64: 8, 32>}, {pipeline_mode = #tpu.pipeline_mode<synchronous>, transform_indices = @transform_1, window_bounds = array<i64: 32, 128>}, {pipeline_mode = #tpu.pipeline_mode<synchronous>, transform_indices = @transform_2, window_bounds = array<i64: 1, 128>}, {pipeline_mode = #tpu.pipeline_mode<synchronous>, transform_indices = @transform_3, window_bounds = array<i64: 128, 128>}, {pipeline_mode = #tpu.pipeline_mode<synchronous>, transform_indices = @transform_4, window_bounds = array<i64: 1, 128>}, {transform_indices = @transform_5, window_bounds = array<i64: 8, 128>}]} {
    %c0 = arith.constant 0 : index
    %c0_0 = arith.constant 0 : index
    %0 = vector.load %arg1[%c0, %c0_0] : memref<8x32xf32, #tpu.memory_space<vmem>>, vector<8x32xf32>
    %c0_1 = arith.constant 0 : index
    %c0_2 = arith.constant 0 : index
    %1 = vector.load %arg2[%c0_1, %c0_2] : memref<32x128xf32, #tpu.memory_space<vmem>>, vector<32x128xf32>
    %c0_3 = arith.constant 0 : index
    %c0_4 = arith.constant 0 : index
    %2 = vector.load %arg3[%c0_3, %c0_4] : memref<1x128xf32, #tpu.memory_space<vmem>>, vector<1x128xf32>
    %cst = arith.constant dense<0.000000e+00> : vector<8x128xf32>
    %3 = tpu.matmul %0, %1, %cst {dimension_numbers = #tpu.dot_dimension_numbers<[1], [0], [0], [1], [0, 0, 1, 1], [], []>} : vector<8x32xf32>, vector<32x128xf32>, vector<8x128xf32> -> vector<8x128xf32>
    %4 = vector.broadcast %2 : vector<1x128xf32> to vector<8x128xf32>
    %5 = arith.addf %3, %4 : vector<8x128xf32>
    %6 = arith.negf %5 : vector<8x128xf32>
    %7 = math.exp %6 : vector<8x128xf32>
    %cst_5 = arith.constant 1.000000e+00 : f32
    %8 = vector.broadcast %cst_5 : f32 to vector<8x128xf32>
    %9 = arith.addf %8, %7 : vector<8x128xf32>
    %10 = arith.divf %8, %9 : vector<8x128xf32>
    %c0_6 = arith.constant 0 : index
    %c0_7 = arith.constant 0 : index
    %11 = vector.load %arg4[%c0_6, %c0_7] : memref<128x128xf32, #tpu.memory_space<vmem>>, vector<128x128xf32>
    %c0_8 = arith.constant 0 : index
    %c0_9 = arith.constant 0 : index
    %12 = vector.load %arg5[%c0_8, %c0_9] : memref<1x128xf32, #tpu.memory_space<vmem>>, vector<1x128xf32>
    %cst_10 = arith.constant dense<0.000000e+00> : vector<8x128xf32>
    %13 = tpu.matmul %10, %11, %cst_10 {dimension_numbers = #tpu.dot_dimension_numbers<[1], [0], [0], [1], [0, 0, 1, 1], [], []>} : vector<8x128xf32>, vector<128x128xf32>, vector<8x128xf32> -> vector<8x128xf32>
    %14 = vector.broadcast %12 : vector<1x128xf32> to vector<8x128xf32>
    %15 = arith.addf %13, %14 : vector<8x128xf32>
    %16 = arith.negf %15 : vector<8x128xf32>
    %17 = math.exp %16 : vector<8x128xf32>
    %cst_11 = arith.constant 1.000000e+00 : f32
    %18 = vector.broadcast %cst_11 : f32 to vector<8x128xf32>
    %19 = arith.addf %18, %17 : vector<8x128xf32>
    %20 = arith.divf %18, %19 : vector<8x128xf32>
    %c0_12 = arith.constant 0 : index
    %c0_13 = arith.constant 0 : index
    %21 = vector.load %arg6[%c0_12, %c0_13] : memref<8x128xf32, #tpu.memory_space<vmem>>, vector<8x128xf32>
    tpu.vector_store %arg6[%c0_12, %c0_13], %20 {strides = array<i32>} : memref<8x128xf32, #tpu.memory_space<vmem>>, vector<8x128xf32>,
    return
  }
  func.func @transform_0(%arg0: i32) -> (i32, i32) {
    %c0_i32 = arith.constant 0 : i32
    %c0_i32_0 = arith.constant 0 : i32
    return %arg0, %c0_i32 : i32, i32
  }
  func.func @transform_1(%arg0: i32) -> (i32, i32) {
    %c0_i32 = arith.constant 0 : i32
    %c0_i32_0 = arith.constant 0 : i32
    %c0_i32_1 = arith.constant 0 : i32
    return %c0_i32, %c0_i32_0 : i32, i32
  }
  func.func @transform_2(%arg0: i32) -> (i32, i32) {
    %c0_i32 = arith.constant 0 : i32
    %c0_i32_0 = arith.constant 0 : i32
    %c0_i32_1 = arith.constant 0 : i32
    return %c0_i32, %c0_i32_0 : i32, i32
  }
  func.func @transform_3(%arg0: i32) -> (i32, i32) {
    %c0_i32 = arith.constant 0 : i32
    %c0_i32_0 = arith.constant 0 : i32
    %c0_i32_1 = arith.constant 0 : i32
    return %c0_i32, %c0_i32_0 : i32, i32
  }
  func.func @transform_4(%arg0: i32) -> (i32, i32) {
    %c0_i32 = arith.constant 0 : i32
    %c0_i32_0 = arith.constant 0 : i32
    %c0_i32_1 = arith.constant 0 : i32
    return %c0_i32, %c0_i32_0 : i32, i32
  }
  func.func @transform_5(%arg0: i32) -> (i32, i32) {
    %c0_i32 = arith.constant 0 : i32
    %c0_i32_0 = arith.constant 0 : i32
    return %arg0, %c0_i32 : i32, i32
  }
}

</mosaic_0001>

<bundles_post_ra>
// kernel: _fused_forward.1
= control target key start
LH: loop header
LB: loop body
LE: loop exit
PB: predicated region body
PF: predicated region fallthrough
CT: control target
= control target key end

     0   :  { %10 = vsyncpa [#allocation3], 0  ;;  %s581_s0 = inlined_call_operand.hbm [shape: f32[8,32], index: 0, kind: input, shape index: {}]   ;;  %s582_s1 = inlined_call_operand.hbm [shape: f32[32,128], index: 1, kind: input, shape index: {}]   ;;  %s583_s2 = inlined_call_operand.vmem [shape: f32[1,128], index: 2, kind: input, shape index: {}]   ;;  %s584_s3 = inlined_call_operand.hbm [shape: f32[128,128], index: 3, kind: input, shape index: {}]   ;;  %s585_s4 = inlined_call_operand.vmem [shape: f32[1,128], index: 4, kind: input, shape index: {}]   ;;  %s586_s5 = inlined_call_operand.hbm [shape: f32[8,128], index: 5, kind: output, shape index: {}]  }
   0x1   :  { %11 = vsyncpa [#allocation6], 0 }
   0x2   :  { %12 = vsyncpa [#allocation4], 0  ;;  %s482_s18 = smov [#allocation5]   ;;  %s388_s22 = scalar_lea.hbm %s582_s1, 512 }
   0x3   :  { %s28_s19 = sshll.u32 %s482_s18, 4  ;;  %p389_p0 = scmp.ne.s32.totalorder %s582_s1, %s388_s22  ;;  %s29_s19 = int_to_ptr.vmem [resolvable:$true] %s28_s19 }
   0x4   :  { %p392_p1 = scmp.lt.u32.totalorder %s388_s22, %s582_s1 }
   0x6   :  { %p394_p2 = pnand %p392_p1, %p389_p0 }
   0x8   :  { %397 = shalt.err (!%p394_p2)
}
   0x9   :  { %s398_s27 = scalar_lea.vmem %s29_s19, 512  ;;  %p403_p4 = scmp.lt.s32.totalorder %s29_s19, %s29_s19 }
   0xa   :  { %p399_p3 = scmp.ne.s32.totalorder %s29_s19, %s398_s27  ;;  %p404_p5 = scmp.lt.s32.totalorder %s398_s27, %s398_s27 }
   0xc   :  { %p405_p6 = por %p404_p5, %p403_p4 }
   0xe   :  { %p406_p7 = pnand %p405_p6, %p399_p3 }
  0x10   :  { %409 = shalt.err (!%p406_p7)
}
  0x11   :  { %s483_s28 = smov 128   ;;  %s484_s29 = smov 8  }
  0x12   :  { %34 = dma.hbm_to_vmem [thread:$0]  %s582_s1, 512, %s29_s19, [#allocation6], %s483_s28, %s483_s28, %s484_s29  }
  0x13   :  { %s485_s7 = smov [#allocation2]   ;;  %s486_s9 = smov [#allocation7]  }
  0x14   :  { %s19_s8 = sshll.u32 %s485_s7, 4  ;;  %s42_s10 = sshll.u32 %s486_s9, 4  ;;  %s20_s8 = int_to_ptr.vmem [resolvable:$true] %s19_s8  ;;  %s43_s10 = int_to_ptr.vmem [resolvable:$true] %s42_s10 }
  0x15   :  { %s410_s13 = scalar_lea.hbm %s581_s0, 128 }
  0x16   :  { %p411_p8 = scmp.ne.s32.totalorder %s581_s0, %s410_s13  ;;  %p414_p9 = scmp.lt.u32.totalorder %s410_s13, %s581_s0 }
  0x18   :  { %p416_p10 = pnand %p414_p9, %p411_p8 }
  0x1a   :  { %419 = shalt.err (!%p416_p10)
}
  0x1b   :  { %s420_s1 = scalar_lea.vmem %s20_s8, 128  ;;  %p425_p12 = scmp.lt.s32.totalorder %s20_s8, %s20_s8 }
  0x1c   :  { %p421_p11 = scmp.ne.s32.totalorder %s20_s8, %s420_s1  ;;  %p426_p13 = scmp.lt.s32.totalorder %s420_s1, %s420_s1 }
  0x1e   :  { %p427_p0 = por %p426_p13, %p425_p12 }
  0x20   :  { %p428_p1 = pnand %p427_p0, %p421_p11 }
  0x22   :  { %431 = shalt.err (!%p428_p1)
}
  0x23   :  { %22 = dma.hbm_to_vmem [thread:$0]  %s581_s0, 128, %s20_s8, [#allocation3]  }
  0x24   :  { %s432_s22 = scalar_lea.hbm %s584_s3, 2048 }
  0x25   :  { %p433_p2 = scmp.ne.s32.totalorder %s584_s3, %s432_s22  ;;  %p436_p3 = scmp.lt.u32.totalorder %s432_s22, %s584_s3 }
  0x27   :  { %p438_p4 = pnand %p436_p3, %p433_p2 }
  0x29   :  { %441 = shalt.err (!%p438_p4)
}
  0x2a   :  { %s442_s27 = scalar_lea.vmem %s43_s10, 2048  ;;  %p447_p6 = scmp.lt.s32.totalorder %s43_s10, %s43_s10 }
  0x2b   :  { %p443_p5 = scmp.ne.s32.totalorder %s43_s10, %s442_s27  ;;  %p448_p7 = scmp.lt.s32.totalorder %s442_s27, %s442_s27 }
  0x2d   :  { %p449_p8 = por %p448_p7, %p447_p6 }
  0x2f   :  { %p450_p9 = pnand %p449_p8, %p443_p5 }
  0x31   :  { %453 = shalt.err (!%p450_p9)
}
  0x32   :  { %48 = dma.hbm_to_vmem [thread:$0]  %s584_s3, 2048, %s43_s10, [#allocation6], %s483_s28, %s483_s28, %s484_s29  }
  0x33   :  { %476 = dma.done.wait [#allocation3], 128  }
  0x34   :  { %477 = vsyncadd [#allocation3], 4294967168 }
  0x35   :  { %478 = dma.done.wait [#allocation6], 2560  }
  0x36   :  { %479 = vsyncadd [#allocation6], 4294964736  ;;  %v487_v0 = vmov 0.0|0.0   ;;  %vm488_vm0 = vmmov 0   ;;  %v489_v1 = vmov 0.0   ;;  %v61_v2 = vld [vmem:[#allocation5] sm:$0xff] }
  0x37   :  { %341 = vmatprep.subr.bf16.mxu0 %v487_v0  ;;  %303 = vmatprep.mubr.msk.f32.mxu0 %vm488_vm0, %v489_v1  ;;  %v62_v3 = vld [vmem:[#allocation5 + $0x8] sm:$0xff]  ;;  %v63_v4 = vld [vmem:[#allocation5 + $0x10] sm:$0xff]  ;;  %v64_v6 = vld [vmem:[#allocation5 + $0x18] sm:$0xff]  ;;  %vm72_vm1 = vcmask 261120  }
  0x38   :  { %347 = vmatprep.subr.bf16.mxu1 %v487_v0  ;;  %338 = vmatprep.mubr.msk.f32.mxu1 %vm488_vm0, %v489_v1  ;;  %v342_v5 = vpack.c.bf16 %v62_v3, %v61_v2  ;;  %v152_v7 = vld [vmem:[#allocation7] sm:$0xff]  ;;  %v153_v8 = vld [vmem:[#allocation7 + $0x8] sm:$0xff]  ;;  %v345_v9 = vpack.c.bf16 %v64_v6, %v63_v4  ;;  %v60_v11 = vld [vmem:[#allocation2] sm:$0xff] }
  0x39   :  { %v348_v10 = vpack.c.bf16 %v153_v8, %v152_v7  ;;  %v154_v12 = vld [vmem:[#allocation7 + $0x10] sm:$0xff]  ;;  %v155_v13 = vld [vmem:[#allocation7 + $0x18] sm:$0xff]  ;;  %v156_v15 = vld [vmem:[#allocation7 + $0x20] sm:$0xff] }
  0x3a   :  { %343 = vmatpush3.bf16.msra.mxu0 %v342_v5  ;;  %v351_v14 = vpack.c.bf16 %v155_v13, %v154_v12  ;;  %v157_v16 = vld [vmem:[#allocation7 + $0x28] sm:$0xff]  ;;  %v158_v18 = vld [vmem:[#allocation7 + $0x30] sm:$0xff]  ;;  %v159_v19 = vld [vmem:[#allocation7 + $0x38] sm:$0xff] }
  0x3b   :  { %344 = vmatprep.subr.bf16.mxu0 %v487_v0  ;;  %349 = vmatpush3.bf16.msra.mxu1 %v348_v10  ;;  %v354_v17 = vpack.c.bf16 %v157_v16, %v156_v15  ;;  %v357_v20 = vpack.c.bf16 %v159_v19, %v158_v18  ;;  %v160_v21 = vld [vmem:[#allocation7 + $0x40] sm:$0xff]  ;;  %v161_v22 = vld [vmem:[#allocation7 + $0x48] sm:$0xff]  ;;  %v162_v24 = vld [vmem:[#allocation7 + $0x50] sm:$0xff] }
  0x3c   :  { %350 = vmatprep.subr.bf16.mxu1 %v487_v0  ;;  %v360_v23 = vpack.c.bf16 %v161_v22, %v160_v21  ;;  %v163_v25 = vld [vmem:[#allocation7 + $0x58] sm:$0xff]  ;;  %v164_v27 = vld [vmem:[#allocation7 + $0x60] sm:$0xff]  ;;  %v165_v28 = vld [vmem:[#allocation7 + $0x68] sm:$0xff] }
  0x3d   :  { %v363_v26 = vpack.c.bf16 %v163_v25, %v162_v24  ;;  %v366_v29 = vpack.c.bf16 %v165_v28, %v164_v27  ;;  %v166_v30 = vld [vmem:[#allocation7 + $0x70] sm:$0xff]  ;;  %v167_v31 = vld [vmem:[#allocation7 + $0x78] sm:$0xff] }
  0x3e   :  { %346 = vmatpush3.bf16.msra.mxu0 %v345_v9  ;;  %v369_v32 = vpack.c.bf16 %v167_v31, %v166_v30  ;;  %v268_v33 = vld [vmem:[%s583_s2] ss:$0 sm:$0xff]  ;;  %s490_s2 = smov [#allocation8]  }
  0x3f   :  { %352 = vmatpush3.bf16.msra.mxu1 %v351_v14  ;;  %v271_v41 = vld [vmem:[%s585_s4] ss:$0 sm:$0xff]  ;;  %s258_s7 = sshll.u32 %s490_s2, 4  ;;  %s259_s7 = int_to_ptr.vmem [resolvable:$true] %s258_s7 }
  0x40   :  { %353 = vmatprep.subr.bf16.mxu1 %v487_v0  ;;  %s454_s8 = scalar_lea.vmem %s259_s7, 128  ;;  %p459_p11 = scmp.lt.s32.totalorder %s259_s7, %s259_s7 }
  0x41   :  { %304 = vmatmul.mubr.msk.f32.vlgmr.msra.gmra.mrb[0].mxu0 %vm72_vm1, %v60_v11  ;;  %p455_p10 = scmp.ne.s32.totalorder %s259_s7, %s454_s8  ;;  %p460_p12 = scmp.lt.s32.totalorder %s454_s8, %s454_s8 }
  0x43   :  { %355 = vmatpush3.bf16.msra.mxu1 %v354_v17  ;;  %p461_p13 = por %p460_p12, %p459_p11 }
  0x44   :  { %356 = vmatprep.subr.bf16.mxu1 %v487_v0 }
  0x45   :  { %p462_p0 = pnand %p461_p13, %p455_p10 }
  0x47   :  { %358 = vmatpush3.bf16.msra.mxu1 %v357_v20 }
  0x48   :  { %359 = vmatprep.subr.bf16.mxu1 %v487_v0 }
  0x4b   :  { %361 = vmatpush3.bf16.msra.mxu1 %v360_v23 }
  0x4c   :  { %362 = vmatprep.subr.bf16.mxu1 %v487_v0 }
  0x4f   :  { %364 = vmatpush3.bf16.msra.mxu1 %v363_v26 }
  0x50   :  { %365 = vmatprep.subr.bf16.mxu1 %v487_v0 }
  0x53   :  { %367 = vmatpush3.bf16.msra.mxu1 %v366_v29 }
  0x54   :  { %368 = vmatprep.subr.bf16.mxu1 %v487_v0 }
  0x57   :  { %370 = vmatpush3.bf16.msra.mxu1 %v369_v32 }
 0x114   :  { %v142_v34 = vpop.f32.mrb[0].mxu0 }
 0x115   :  { %v143_v35 = vadd.f32 %v268_v33, %v142_v34  ;;  %v305_v36 = vpop.f32.mrb[1].mxu0 }
 0x117   :  { %v270_v37 = vmul.f32 -1.442695, %v143_v35 }
 0x119   :  { %380 = vpow2.f32 %v270_v37 }
 0x123   :  { %v381_v38 = vpop.eup %380 }
 0x124   :  { %v149_v39 = vadd.f32 1.0, %v381_v38 }
 0x126   :  { %382 = vrcp.f32 %v149_v39 }
 0x130   :  { %v383_v40 = vpop.eup %382 }
 0x131   :  { %339 = vmatmul.mubr.f32.vlgmr.msra.gmra.mrb[0].mxu1 %v383_v40 }
 0x204   :  { %v241_v42 = vpop.f32.mrb[0].mxu1 }
 0x205   :  { %v242_v43 = vadd.f32 %v271_v41, %v241_v42  ;;  %v340_v44 = vpop.f32.mrb[1].mxu1 }
 0x207   :  { %v272_v45 = vmul.f32 -1.442695, %v242_v43 }
 0x209   :  { %384 = vpow2.f32 %v272_v45 }
 0x213   :  { %v385_v46 = vpop.eup %384 }
 0x214   :  { %v248_v47 = vadd.f32 1.0, %v385_v46 }
 0x216   :  { %386 = vrcp.f32 %v248_v47 }
 0x220   :  { %v387_v48 = vpop.eup %386 }
 0x221   :  { %251 = vst [vmem:[#allocation8] sm:$0xff] %v387_v48 }
 0x222   :  { %465 = shalt.err (!%p462_p0)
}
 0x223   :  { %s466_s10 = scalar_lea.hbm %s586_s5, 128 }
 0x224   :  { %p467_p1 = scmp.ne.s32.totalorder %s586_s5, %s466_s10  ;;  %p470_p2 = scmp.lt.u32.totalorder %s466_s10, %s586_s5 }
 0x226   :  { %p472_p3 = pnand %p470_p2, %p467_p1 }
 0x228   :  { %475 = shalt.err (!%p472_p3)
}
 0x229   :  { %261 = dma.vmem_to_hbm [thread:$0]  %s259_s7, 128, %s586_s5, [#allocation4]  }
 0x22a   :  { %480 = dma.done.wait [#allocation4], 128  }
 0x22b   :  { %481 = vsyncadd [#allocation4], 4294967168 }
 0x22c   :  { %265 = vsyncpa [#allocation3], 1 }
 0x22d   :  { %266 = vsyncpa [#allocation6], 1 }
 0x22e   :  { %267 = vsyncpa [#allocation4], 1 }

// kernel: _fused_forward.1
= control target key start
LH: loop header
LB: loop body
LE: loop exit
PB: predicated region body
PF: predicated region fallthrough
CT: control target
= control target key end

     0   :  { %10 = vsyncpa [#allocation3], 0  ;;  %s581_s0 = inlined_call_operand.hbm [shape: f32[8,32], index: 0, kind: input, shape index: {}]   ;;  %s582_s1 = inlined_call_operand.hbm [shape: f32[32,128], index: 1, kind: input, shape index: {}]   ;;  %s583_s2 = inlined_call_operand.vmem [shape: f32[1,128], index: 2, kind: input, shape index: {}]   ;;  %s584_s3 = inlined_call_operand.hbm [shape: f32[128,128], index: 3, kind: input, shape index: {}]   ;;  %s585_s4 = inlined_call_operand.vmem [shape: f32[1,128], index: 4, kind: input, shape index: {}]   ;;  %s586_s5 = inlined_call_operand.hbm [shape: f32[8,128], index: 5, kind: output, shape index: {}]  }
   0x1   :  { %11 = vsyncpa [#allocation6], 0 }
   0x2   :  { %12 = vsyncpa [#allocation4], 0  ;;  %s482_s18 = smov [#allocation5]   ;;  %s388_s22 = scalar_lea.hbm %s582_s1, 512 }
   0x3   :  { %s28_s19 = sshll.u32 %s482_s18, 4  ;;  %p389_p0 = scmp.ne.s32.totalorder %s582_s1, %s388_s22  ;;  %s29_s19 = int_to_ptr.vmem [resolvable:$true] %s28_s19 }
   0x4   :  { %p392_p1 = scmp.lt.u32.totalorder %s388_s22, %s582_s1 }
   0x6   :  { %p394_p2 = pnand %p392_p1, %p389_p0 }
   0x8   :  { %397 = shalt.err (!%p394_p2)
}
   0x9   :  { %s398_s27 = scalar_lea.vmem %s29_s19, 512  ;;  %p403_p4 = scmp.lt.s32.totalorder %s29_s19, %s29_s19 }
   0xa   :  { %p399_p3 = scmp.ne.s32.totalorder %s29_s19, %s398_s27  ;;  %p404_p5 = scmp.lt.s32.totalorder %s398_s27, %s398_s27 }
   0xc   :  { %p405_p6 = por %p404_p5, %p403_p4 }
   0xe   :  { %p406_p7 = pnand %p405_p6, %p399_p3 }
  0x10   :  { %409 = shalt.err (!%p406_p7)
}
  0x11   :  { %s483_s28 = smov 128   ;;  %s484_s29 = smov 8  }
  0x12   :  { %34 = dma.hbm_to_vmem [thread:$0]  %s582_s1, 512, %s29_s19, [#allocation6], %s483_s28, %s483_s28, %s484_s29  }
  0x13   :  { %s485_s7 = smov [#allocation2]   ;;  %s486_s9 = smov [#allocation7]  }
  0x14   :  { %s19_s8 = sshll.u32 %s485_s7, 4  ;;  %s42_s10 = sshll.u32 %s486_s9, 4  ;;  %s20_s8 = int_to_ptr.vmem [resolvable:$true] %s19_s8  ;;  %s43_s10 = int_to_ptr.vmem [resolvable:$true] %s42_s10 }
  0x15   :  { %s410_s13 = scalar_lea.hbm %s581_s0, 128 }
  0x16   :  { %p411_p8 = scmp.ne.s32.totalorder %s581_s0, %s410_s13  ;;  %p414_p9 = scmp.lt.u32.totalorder %s410_s13, %s581_s0 }
  0x18   :  { %p416_p10 = pnand %p414_p9, %p411_p8 }
  0x1a   :  { %419 = shalt.err (!%p416_p10)
}
  0x1b   :  { %s420_s1 = scalar_lea.vmem %s20_s8, 128  ;;  %p425_p12 = scmp.lt.s32.totalorder %s20_s8, %s20_s8 }
  0x1c   :  { %p421_p11 = scmp.ne.s32.totalorder %s20_s8, %s420_s1  ;;  %p426_p13 = scmp.lt.s32.totalorder %s420_s1, %s420_s1 }
  0x1e   :  { %p427_p0 = por %p426_p13, %p425_p12 }
  0x20   :  { %p428_p1 = pnand %p427_p0, %p421_p11 }
  0x22   :  { %431 = shalt.err (!%p428_p1)
}
  0x23   :  { %22 = dma.hbm_to_vmem [thread:$0]  %s581_s0, 128, %s20_s8, [#allocation3]  }
  0x24   :  { %s432_s22 = scalar_lea.hbm %s584_s3, 2048 }
  0x25   :  { %p433_p2 = scmp.ne.s32.totalorder %s584_s3, %s432_s22  ;;  %p436_p3 = scmp.lt.u32.totalorder %s432_s22, %s584_s3 }
  0x27   :  { %p438_p4 = pnand %p436_p3, %p433_p2 }
  0x29   :  { %441 = shalt.err (!%p438_p4)
}
  0x2a   :  { %s442_s27 = scalar_lea.vmem %s43_s10, 2048  ;;  %p447_p6 = scmp.lt.s32.totalorder %s43_s10, %s43_s10 }
  0x2b   :  { %p443_p5 = scmp.ne.s32.totalorder %s43_s10, %s442_s27  ;;  %p448_p7 = scmp.lt.s32.totalorder %s442_s27, %s442_s27 }
  0x2d   :  { %p449_p8 = por %p448_p7, %p447_p6 }
  0x2f   :  { %p450_p9 = pnand %p449_p8, %p443_p5 }
  0x31   :  { %453 = shalt.err (!%p450_p9)
}
  0x32   :  { %48 = dma.hbm_to_vmem [thread:$0]  %s584_s3, 2048, %s43_s10, [#allocation6], %s483_s28, %s483_s28, %s484_s29  }
  0x33   :  { %476 = dma.done.wait [#allocation3], 128  }
  0x34   :  { %477 = vsyncadd [#allocation3], 4294967168 }
  0x35   :  { %478 = dma.done.wait [#allocation6], 2560  }
  0x36   :  { %479 = vsyncadd [#allocation6], 4294964736  ;;  %v487_v0 = vmov 0.0|0.0   ;;  %vm488_vm0 = vmmov 0   ;;  %v489_v1 = vmov 0.0   ;;  %v61_v2 = vld [vmem:[#allocation5] sm:$0xff] }
  0x37   :  { %341 = vmatprep.subr.bf16.mxu0 %v487_v0  ;;  %303 = vmatprep.mubr.msk.f32.mxu0 %vm488_vm0, %v489_v1  ;;  %v62_v3 = vld [vmem:[#allocation5 + $0x8] sm:$0xff]  ;;  %v63_v4 = vld [vmem:[#allocation5 + $0x10] sm:$0xff]  ;;  %v64_v6 = vld [vmem:[#allocation5 + $0x18] sm:$0xff]  ;;  %vm72_vm1 = vcmask 261120  }
  0x38   :  { %347 = vmatprep.subr.bf16.mxu1 %v487_v0  ;;  %338 = vmatprep.mubr.msk.f32.mxu1 %vm488_vm0, %v489_v1  ;;  %v342_v5 = vpack.c.bf16 %v62_v3, %v61_v2  ;;  %v152_v7 = vld [vmem:[#allocation7] sm:$0xff]  ;;  %v153_v8 = vld [vmem:[#allocation7 + $0x8] sm:$0xff]  ;;  %v345_v9 = vpack.c.bf16 %v64_v6, %v63_v4  ;;  %v60_v11 = vld [vmem:[#allocation2] sm:$0xff] }
  0x39   :  { %v348_v10 = vpack.c.bf16 %v153_v8, %v152_v7  ;;  %v154_v12 = vld [vmem:[#allocation7 + $0x10] sm:$0xff]  ;;  %v155_v13 = vld [vmem:[#allocation7 + $0x18] sm:$0xff]  ;;  %v156_v15 = vld [vmem:[#allocation7 + $0x20] sm:$0xff] }
  0x3a   :  { %343 = vmatpush3.bf16.msra.mxu0 %v342_v5  ;;  %v351_v14 = vpack.c.bf16 %v155_v13, %v154_v12  ;;  %v157_v16 = vld [vmem:[#allocation7 + $0x28] sm:$0xff]  ;;  %v158_v18 = vld [vmem:[#allocation7 + $0x30] sm:$0xff]  ;;  %v159_v19 = vld [vmem:[#allocation7 + $0x38] sm:$0xff] }
  0x3b   :  { %344 = vmatprep.subr.bf16.mxu0 %v487_v0  ;;  %349 = vmatpush3.bf16.msra.mxu1 %v348_v10  ;;  %v354_v17 = vpack.c.bf16 %v157_v16, %v156_v15  ;;  %v357_v20 = vpack.c.bf16 %v159_v19, %v158_v18  ;;  %v160_v21 = vld [vmem:[#allocation7 + $0x40] sm:$0xff]  ;;  %v161_v22 = vld [vmem:[#allocation7 + $0x48] sm:$0xff]  ;;  %v162_v24 = vld [vmem:[#allocation7 + $0x50] sm:$0xff] }
  0x3c   :  { %350 = vmatprep.subr.bf16.mxu1 %v487_v0  ;;  %v360_v23 = vpack.c.bf16 %v161_v22, %v160_v21  ;;  %v163_v25 = vld [vmem:[#allocation7 + $0x58] sm:$0xff]  ;;  %v164_v27 = vld [vmem:[#allocation7 + $0x60] sm:$0xff]  ;;  %v165_v28 = vld [vmem:[#allocation7 + $0x68] sm:$0xff] }
  0x3d   :  { %v363_v26 = vpack.c.bf16 %v163_v25, %v162_v24  ;;  %v366_v29 = vpack.c.bf16 %v165_v28, %v164_v27  ;;  %v166_v30 = vld [vmem:[#allocation7 + $0x70] sm:$0xff]  ;;  %v167_v31 = vld [vmem:[#allocation7 + $0x78] sm:$0xff] }
  0x3e   :  { %346 = vmatpush3.bf16.msra.mxu0 %v345_v9  ;;  %v369_v32 = vpack.c.bf16 %v167_v31, %v166_v30  ;;  %v268_v33 = vld [vmem:[%s583_s2] ss:$0 sm:$0xff]  ;;  %s490_s2 = smov [#allocation8]  }
  0x3f   :  { %352 = vmatpush3.bf16.msra.mxu1 %v351_v14  ;;  %v271_v41 = vld [vmem:[%s585_s4] ss:$0 sm:$0xff]  ;;  %s258_s7 = sshll.u32 %s490_s2, 4  ;;  %s259_s7 = int_to_ptr.vmem [resolvable:$true] %s258_s7 }
  0x40   :  { %353 = vmatprep.subr.bf16.mxu1 %v487_v0  ;;  %s454_s8 = scalar_lea.vmem %s259_s7, 128  ;;  %p459_p11 = scmp.lt.s32.totalorder %s259_s7, %s259_s7 }
  0x41   :  { %304 = vmatmul.mubr.msk.f32.vlgmr.msra.gmra.mrb[0].mxu0 %vm72_vm1, %v60_v11  ;;  %p455_p10 = scmp.ne.s32.totalorder %s259_s7, %s454_s8  ;;  %p460_p12 = scmp.lt.s32.totalorder %s454_s8, %s454_s8 }
  0x43   :  { %355 = vmatpush3.bf16.msra.mxu1 %v354_v17  ;;  %p461_p13 = por %p460_p12, %p459_p11 }
  0x44   :  { %356 = vmatprep.subr.bf16.mxu1 %v487_v0 }
  0x45   :  { %p462_p0 = pnand %p461_p13, %p455_p10 }
  0x47   :  { %358 = vmatpush3.bf16.msra.mxu1 %v357_v20 }
  0x48   :  { %359 = vmatprep.subr.bf16.mxu1 %v487_v0 }
  0x4b   :  { %361 = vmatpush3.bf16.msra.mxu1 %v360_v23 }
  0x4c   :  { %362 = vmatprep.subr.bf16.mxu1 %v487_v0 }
  0x4f   :  { %364 = vmatpush3.bf16.msra.mxu1 %v363_v26 }
  0x50   :  { %365 = vmatprep.subr.bf16.mxu1 %v487_v0 }
  0x53   :  { %367 = vmatpush3.bf16.msra.mxu1 %v366_v29 }
  0x54   :  { %368 = vmatprep.subr.bf16.mxu1 %v487_v0 }
  0x57   :  { %370 = vmatpush3.bf16.msra.mxu1 %v369_v32 }
 0x114   :  { %v142_v34 = vpop.f32.mrb[0].mxu0 }
 0x115   :  { %v143_v35 = vadd.f32 %v268_v33, %v142_v34  ;;  %v305_v36 = vpop.f32.mrb[1].mxu0 }
 0x117   :  { %v270_v37 = vmul.f32 -1.442695, %v143_v35 }
 0x119   :  { %380 = vpow2.f32 %v270_v37 }
 0x123   :  { %v381_v38 = vpop.eup %380 }
 0x124   :  { %v149_v39 = vadd.f32 1.0, %v381_v38 }
 0x126   :  { %382 = vrcp.f32 %v149_v39 }
 0x130   :  { %v383_v40 = vpop.eup %382 }
 0x131   :  { %339 = vmatmul.mubr.f32.vlgmr.msra.gmra.mrb[0].mxu1 %v383_v40 }
 0x204   :  { %v241_v42 = vpop.f32.mrb[0].mxu1 }
 0x205   :  { %v242_v43 = vadd.f32 %v271_v41, %v241_v42  ;;  %v340_v44 = vpop.f32.mrb[1].mxu1 }
 0x207   :  { %v272_v45 = vmul.f32 -1.442695, %v242_v43 }
 0x209   :  { %384 = vpow2.f32 %v272_v45 }
 0x213   :  { %v385_v46 = vpop.eup %384 }
 0x214   :  { %v248_v47 = vadd.f32 1.0, %v385_v46 }
 0x216   :  { %386 = vrcp.f32 %v248_v47 }
 0x220   :  { %v387_v48 = vpop.eup %386 }
 0x221   :  { %251 = vst [vmem:[#allocation8] sm:$0xff] %v387_v48 }
 0x222   :  { %465 = shalt.err (!%p462_p0)
}
 0x223   :  { %s466_s10 = scalar_lea.hbm %s586_s5, 128 }
 0x224   :  { %p467_p1 = scmp.ne.s32.totalorder %s586_s5, %s466_s10  ;;  %p470_p2 = scmp.lt.u32.totalorder %s466_s10, %s586_s5 }
 0x226   :  { %p472_p3 = pnand %p470_p2, %p467_p1 }
 0x228   :  { %475 = shalt.err (!%p472_p3)
}
 0x229   :  { %261 = dma.vmem_to_hbm [thread:$0]  %s259_s7, 128, %s586_s5, [#allocation4]  }
 0x22a   :  { %480 = dma.done.wait [#allocation4], 128  }
 0x22b   :  { %481 = vsyncadd [#allocation4], 4294967168 }
 0x22c   :  { %265 = vsyncpa [#allocation3], 1 }
 0x22d   :  { %266 = vsyncpa [#allocation6], 1 }
 0x22e   :  { %267 = vsyncpa [#allocation4], 1 }

</bundles_post_ra>
